<compile_context>
chip_gen: v7x
topology: tpu7x:2x2x1
jax: 0.10.0
libtpu: 0.0.40
codegen_flags: <defaults>
</compile_context>

<pallas_src>
import numpy as np
import jax
import jax.numpy as jnp
from jax.experimental import pallas as pl
from jax.experimental.pallas import tpu as pltpu


# ---------------------------------------------------------------------------
# Fused kernel: text heads -> concat -> dense upsample -> conv stage -> output
# ---------------------------------------------------------------------------
def _fused_kernel(patches_ref, other_ref, wpack_ref, vpack_ref, o_ref):
    f32, bf16 = jnp.float32, jnp.bfloat16
    B, n_other = other_ref.shape
    D = wpack_ref.shape[1]             # conv-stage lane width (= C * S = 128)
    KME = patches_ref.shape[1]         # heads * 7 taps * emb_dim
    TT = patches_ref.shape[0] // B     # text conv output positions per sample

    # static row offsets into the packed weight / packed vector arrays
    WT, WUA = 0, KME
    WUB = WUA + D
    M1 = WUB + n_other
    M2, M3, M4, MF = M1 + D, M1 + 2 * D, M1 + 3 * D, M1 + 4 * D
    VTB, VUP, VB1, VB2, VB3, VB4 = TT, TT + 1, TT + 2, TT + 3, TT + 4, TT + 5

    # ---- 4 text heads x 3 conv branches: ONE matmul, masked global max ----
    y = jnp.dot(patches_ref[...].astype(bf16), wpack_ref[WT:WT + KME, :],
                preferred_element_type=f32)
    y = jnp.maximum(y + vpack_ref[VTB:VTB + 1, :], 0.0)           # conv bias + ReLU
    y = y.reshape(B, TT, D) * vpack_ref[0:TT, :][None]            # zero invalid positions
    tfeat = jnp.max(y, axis=1)                                    # (B, D) global max pool

    # ---- dense upsample: BN0 folded into weights/bias, CELU(alpha=1) ----
    hd = (jnp.dot(tfeat.astype(bf16), wpack_ref[WUA:WUA + D, :],
                  preferred_element_type=f32)
          + jnp.dot(other_ref[...].astype(bf16), wpack_ref[WUB:WUB + n_other, :],
                    preferred_element_type=f32)
          + vpack_ref[VUP:VUP + 1, :])
    hd = jnp.where(hd > 0, hd, jnp.exp(jnp.minimum(hd, 0.0)) - 1.0)

    # ---- conv stage: every block is ONE (B, D) x (D, D) matmul ----
    # block1: BN -> Conv(C->2C, k5, p2) -> AdaptiveAvgPool(S/2) -> ReLU
    a1 = jnp.maximum(
        jnp.dot(hd.astype(bf16), wpack_ref[M1:M1 + D, :], preferred_element_type=f32)
        + vpack_ref[VB1:VB1 + 1, :], 0.0)
    # block2 / block3: BN -> Conv(2C->2C, k3, p1) -> ReLU
    a2 = jnp.maximum(
        jnp.dot(a1.astype(bf16), wpack_ref[M2:M2 + D, :], preferred_element_type=f32)
        + vpack_ref[VB2:VB2 + 1, :], 0.0)
    a3 = jnp.maximum(
        jnp.dot(a2.astype(bf16), wpack_ref[M3:M3 + D, :], preferred_element_type=f32)
        + vpack_ref[VB3:VB3 + 1, :], 0.0)
    # block4: BN -> depthwise Conv(k5, p2); residual from block2; ReLU
    y4 = (jnp.dot(a3.astype(bf16), wpack_ref[M4:M4 + D, :], preferred_element_type=f32)
          + vpack_ref[VB4:VB4 + 1, :])
    r = jnp.maximum(y4 + a2, 0.0)

    # ---- out_layers: AvgPool1d(4,2,1) + Flatten + Linear folded into one matmul ----
    o_ref[...] = jnp.dot(r.astype(bf16), wpack_ref[MF:MF + D, :],
                         preferred_element_type=f32)


# ---------------------------------------------------------------------------
# Deterministic parameter construction (numpy, eval-mode folding)
# ---------------------------------------------------------------------------
def _bn_fold(rng, n):
    gamma = rng.standard_normal(n).astype(np.float32) * 0.1 + 1.0
    beta = rng.standard_normal(n).astype(np.float32) * 0.1
    mean = rng.standard_normal(n).astype(np.float32) * 0.1
    var = rng.uniform(0.5, 1.5, n).astype(np.float32)
    scale = gamma / np.sqrt(var + 1e-5)
    shift = beta - mean * scale
    return scale, shift


def init_model(seed=0):
    rng = np.random.default_rng(seed)
    cfg = dict(seq_len=16, num_words=50, embedding_dim=8, conv_out_size=8,
               other_embedding_dim=8, num_dim=8, n_heads=4,
               soft=dict(input_dim=128, output_dim=16, in_num_kernels=8, chunk_size=16))
    L, E, Co, H = cfg["seq_len"], cfg["embedding_dim"], cfg["conv_out_size"], cfg["n_heads"]
    OE, ND = cfg["other_embedding_dim"], cfg["num_dim"]
    sc = cfg["soft"]
    in_dim, out_dim = sc["input_dim"], sc["output_dim"]
    C, S = sc["in_num_kernels"], sc["chunk_size"]
    C2, S1, Lp = 2 * C, S // 2, S // 4
    D = C * S                                  # conv-stage lane width (128)
    KM, TT = 7, (L - 3) // 2 + 1
    n_text, n_other = H * 3 * Co, 3 * OE + ND
    assert n_text + n_other == in_dim and S1 * C2 == D and n_text <= D and out_dim <= D

    # --- text heads: embeddings + 7-tap zero-padded conv weights, bias, validity mask
    emb_tables = []
    wtext = np.zeros((H * KM * E, D), np.float32)
    tbias = np.zeros((1, D), np.float32)
    tmask = np.zeros((TT, D), np.float32)
    for h in range(H):
        emb = rng.standard_normal((cfg["num_words"] + 1, E)).astype(np.float32) * 0.1
        emb[0] = 0.0                                          # padding_idx = 0
        emb_tables.append(emb)
        for bi, K in enumerate((3, 5, 7)):
            w = rng.standard_normal((Co, E, K)).astype(np.float32) * 0.1
            b = rng.standard_normal(Co).astype(np.float32) * 0.1
            c0 = (h * 3 + bi) * Co
            for k in range(K):
                r0 = (h * KM + k) * E
                wtext[r0:r0 + E, c0:c0 + Co] = w[:, :, k].T
            tbias[0, c0:c0 + Co] = b
            tmask[:(L - K) // 2 + 1, c0:c0 + Co] = 1.0

    # --- other embedding tables
    def make_emb(vocab):
        t = rng.standard_normal((vocab + 1, OE)).astype(np.float32) * 0.1
        t[0] = 0.0
        return t
    adv_emb, ad_emb, disp_emb = make_emb(14705), make_emb(10000), make_emb(10000)

    # --- dense_upsample: BN0 + weight_norm(Linear) folded; hd columns ordered (s, c)
    s0, t0 = _bn_fold(rng, in_dim)
    wlin = rng.standard_normal((C * S, in_dim)).astype(np.float32) * 0.1
    wperm = np.zeros((in_dim, D), np.float32)
    for s in range(S):
        for c in range(C):
            wperm[:, s * C + c] = wlin[c * S + s, :]
    wup = s0[:, None] * wperm
    b_up = (t0 @ wperm)[None, :].astype(np.float32)
    wup_text = np.zeros((D, D), np.float32)
    wup_text[:n_text, :] = wup[:n_text, :]       # rows >= n_text hit zero-padded features
    wup_other = wup[n_text:, :]                  # (n_other, D)

    # --- conv_block1 (BN -> Conv k5 p2 -> AdaptiveAvgPool S/2) as one (D, D) matrix
    w1 = rng.standard_normal((C2, C, 5)).astype(np.float32) * 0.1
    s1, t1 = _bn_fold(rng, C)
    m1 = np.zeros((D, D), np.float32)
    b1 = np.zeros((1, D), np.float32)
    for j in range(S1):
        for t in (2 * j, 2 * j + 1):
            for k in range(5):
                p = t + k - 2
                if 0 <= p < S:
                    for ci in range(C):
                        m1[p * C + ci, j * C2:(j + 1) * C2] += 0.5 * w1[:, ci, k] * s1[ci]
                    b1[0, j * C2:(j + 1) * C2] += 0.5 * (w1[:, :, k] @ t1)

    # --- conv_block2 / conv_block3 (BN -> Conv k3 p1) as (D, D) matrices
    def conv_same_mat(K, pad):
        w = rng.standard_normal((C2, C2, K)).astype(np.float32) * 0.1
        scl, shf = _bn_fold(rng, C2)
        m = np.zeros((D, D), np.float32)
        bp = np.zeros((1, D), np.float32)
        for j in range(S1):
            for k in range(K):
                i = j + k - pad
                if 0 <= i < S1:
                    m[i * C2:(i + 1) * C2, j * C2:(j + 1) * C2] += (w[:, :, k] * scl[None, :]).T
                    bp[0, j * C2:(j + 1) * C2] += w[:, :, k] @ shf
        return m, bp

    m2, b2 = conv_same_mat(3, 1)
    m3, b3 = conv_same_mat(3, 1)

    # --- conv_block4 (BN -> depthwise Conv k5 p2) as a (D, D) matrix
    w4 = rng.standard_normal((C2, 1, 5)).astype(np.float32) * 0.1
    s4, t4 = _bn_fold(rng, C2)
    m4 = np.zeros((D, D), np.float32)
    b4 = np.zeros((1, D), np.float32)
    for j in range(S1):
        for k in range(5):
            i = j + k - 2
            if 0 <= i < S1:
                for c in range(C2):
                    m4[i * C2 + c, j * C2 + c] += w4[c, 0, k] * s4[c]
                b4[0, j * C2:(j + 1) * C2] += t4 * w4[:, 0, k]

    # --- out_layers (AvgPool(4,2,1) -> Flatten -> Linear) as a (D, D) matrix
    wout = rng.standard_normal((out_dim, C2 * Lp)).astype(np.float32) * 0.1
    mfin = np.zeros((D, D), np.float32)          # cols >= out_dim stay zero
    for i in range(S1):
        for t in range(Lp):
            if 2 * t - 1 <= i <= 2 * t + 2:
                for c in range(C2):
                    mfin[i * C2 + c, :out_dim] += 0.25 * wout[:, c * Lp + t]

    wpack = np.concatenate([wtext, wup_text, wup_other, m1, m2, m3, m4, mfin], axis=0)
    vpack = np.concatenate([tmask, tbias, b_up, b1, b2, b3, b4], axis=0)
    params = dict(
        text_emb=[jnp.asarray(t) for t in emb_tables],
        adv_emb=jnp.asarray(adv_emb), ad_emb=jnp.asarray(ad_emb),
        disp_emb=jnp.asarray(disp_emb),
        wpack=jnp.asarray(wpack, dtype=jnp.bfloat16),   # all MXU weights, one bf16 input
        vpack=jnp.asarray(vpack),                       # all biases / masks, one f32 input
    )
    return params, cfg


# ---------------------------------------------------------------------------
# Forward: XLA gathers (data-dependent) feeding ONE fused pallas_call
# ---------------------------------------------------------------------------
def model_forward(params, cfg, keyword_x, title_x, description_x, query_x,
                  advertiser_x, ad_x, display_x, num_x):
    B, L = keyword_x.shape
    H, E = cfg["n_heads"], cfg["embedding_dim"]
    out_dim = cfg["soft"]["output_dim"]
    KM, TT = 7, (L - 3) // 2 + 1

    # embedding gathers emitted directly in the im2col patch layout for the kernel
    toks = jnp.stack([keyword_x, title_x, description_x, query_x], axis=0)   # (H, B, L)
    pos = 2 * np.arange(TT)[:, None] + np.arange(KM)[None, :]                # static (TT, KM)
    valid = pos < L
    posc = np.where(valid, pos, 0)
    tokp = toks[:, :, posc]                                                  # (H, B, TT, KM)
    tokp = jnp.where(jnp.asarray(valid)[None, None], tokp, 0)                # OOB -> pad token 0
    embp = jnp.stack([jnp.take(params["text_emb"][h], tokp[h], axis=0)
                      for h in range(H)], axis=2)                            # (B, TT, H, KM, E)
    patches = embp.reshape(B * TT, H * KM * E).astype(jnp.float32)

    other = jnp.concatenate(
        [jnp.take(params["adv_emb"], advertiser_x, axis=0).reshape(B, -1),
         jnp.take(params["ad_emb"], ad_x, axis=0).reshape(B, -1),
         jnp.take(params["disp_emb"], display_x, axis=0).reshape(B, -1),
         num_x.reshape(B, -1)], axis=1).astype(jnp.float32)                  # (B, 32)

    D = params["wpack"].shape[1]
    vm = pl.BlockSpec(memory_space=pltpu.MemorySpace.VMEM)
    out = pl.pallas_call(
        _fused_kernel,
        out_shape=jax.ShapeDtypeStruct((B, D), jnp.float32),   # lane-dense output store
        in_specs=[vm, vm, vm, vm],
        out_specs=vm,
    )(patches, other, params["wpack"], params["vpack"])
    return out[:, :out_dim]


if __name__ == "__main__":
    params, cfg = init_model(seed=0)
    B, L, nw = 2, cfg["seq_len"], cfg["num_words"]
    key = jax.random.PRNGKey(0)
    ks = jax.random.split(key, 8)
    keyword_x = jax.random.randint(ks[0], (B, L), 0, nw + 1)
    title_x = jax.random.randint(ks[1], (B, L), 0, nw + 1)
    description_x = jax.random.randint(ks[2], (B, L), 0, nw + 1)
    query_x = jax.random.randint(ks[3], (B, L), 0, nw + 1)
    advertiser_x = jax.random.randint(ks[4], (B,), 0, 14706)
    ad_x = jax.random.randint(ks[5], (B,), 0, 10001)
    display_x = jax.random.randint(ks[6], (B,), 0, 10001)
    num_x = jax.random.normal(ks[7], (B, cfg["num_dim"]), jnp.float32)

    fwd = jax.jit(lambda p, *a: model_forward(p, cfg, *a))
    out = fwd(params, keyword_x, title_x, description_x, query_x,
              advertiser_x, ad_x, display_x, num_x)
    out = jax.block_until_ready(out)
    assert out.shape == (B, cfg["soft"]["output_dim"])
    assert bool(jnp.all(jnp.isfinite(out)))
    print("KERNEL_OK")
</pallas_src>

<mosaic_0001>
module attributes {stable_mosaic.version = 11 : i64} {
  func.func @_fused_kernel(%arg0: memref<14x224xf32, #tpu.memory_space<vmem>>, %arg1: memref<2x32xf32, #tpu.memory_space<vmem>>, %arg2: memref<1024x128xbf16, #tpu.memory_space<vmem>>, %arg3: memref<13x128xf32, #tpu.memory_space<vmem>>, %arg4: memref<2x128xf32, #tpu.memory_space<vmem>>) attributes {dimension_semantics = [], scalar_prefetch = 0 : i64, scratch_operands = 0 : i64, tpu.core_type = #tpu.core_type<tc>} {
    %c0 = arith.constant 0 : index
    %c0_0 = arith.constant 0 : index
    %0 = vector.load %arg0[%c0, %c0_0] : memref<14x224xf32, #tpu.memory_space<vmem>>, vector<14x224xf32>
    %1 = arith.truncf %0 : vector<14x224xf32> to vector<14x224xbf16>
    %c0_1 = arith.constant 0 : index
    %c0_2 = arith.constant 0 : index
    %2 = vector.load %arg2[%c0_1, %c0_2] : memref<1024x128xbf16, #tpu.memory_space<vmem>>, vector<224x128xbf16>
    %cst = arith.constant dense<0.000000e+00> : vector<14x128xf32>
    %3 = tpu.matmul %1, %2, %cst {dimension_numbers = #tpu.dot_dimension_numbers<[1], [0], [0], [1], [0, 0, 1, 1], [], []>} : vector<14x224xbf16>, vector<224x128xbf16>, vector<14x128xf32> -> vector<14x128xf32>
    %c7 = arith.constant 7 : index
    %c0_3 = arith.constant 0 : index
    %4 = vector.load %arg3[%c7, %c0_3] : memref<13x128xf32, #tpu.memory_space<vmem>>, vector<1x128xf32>
    %5 = vector.broadcast %4 : vector<1x128xf32> to vector<14x128xf32>
    %6 = arith.addf %3, %5 : vector<14x128xf32>
    %cst_4 = arith.constant 0.000000e+00 : f32
    %7 = vector.broadcast %cst_4 : f32 to vector<14x128xf32>
    %8 = arith.maximumf %6, %7 : vector<14x128xf32>
    %9 = vector.shape_cast %8 : vector<14x128xf32> to vector<2x7x128xf32>
    %c0_5 = arith.constant 0 : index
    %c0_6 = arith.constant 0 : index
    %10 = vector.load %arg3[%c0_5, %c0_6] : memref<13x128xf32, #tpu.memory_space<vmem>>, vector<7x128xf32>
    %11 = vector.shape_cast %10 : vector<7x128xf32> to vector<1x7x128xf32>
    %12 = vector.broadcast %11 : vector<1x7x128xf32> to vector<2x7x128xf32>
    %13 = arith.mulf %9, %12 : vector<2x7x128xf32>
    %cst_7 = arith.constant dense<0xFF800000> : vector<2x128xf32>
    %14 = vector.multi_reduction <maximumf>, %13, %cst_7 [1] : vector<2x7x128xf32> to vector<2x128xf32>
    %15 = arith.truncf %14 : vector<2x128xf32> to vector<2x128xbf16>
    %c224 = arith.constant 224 : index
    %c0_8 = arith.constant 0 : index
    %16 = vector.load %arg2[%c224, %c0_8] : memref<1024x128xbf16, #tpu.memory_space<vmem>>, vector<128x128xbf16>
    %cst_9 = arith.constant dense<0.000000e+00> : vector<2x128xf32>
    %17 = tpu.matmul %15, %16, %cst_9 {dimension_numbers = #tpu.dot_dimension_numbers<[1], [0], [0], [1], [0, 0, 1, 1], [], []>} : vector<2x128xbf16>, vector<128x128xbf16>, vector<2x128xf32> -> vector<2x128xf32>
    %c0_10 = arith.constant 0 : index
    %c0_11 = arith.constant 0 : index
    %18 = vector.load %arg1[%c0_10, %c0_11] : memref<2x32xf32, #tpu.memory_space<vmem>>, vector<2x32xf32>
    %19 = arith.truncf %18 : vector<2x32xf32> to vector<2x32xbf16>
    %c352 = arith.constant 352 : index
    %c0_12 = arith.constant 0 : index
    %20 = vector.load %arg2[%c352, %c0_12] : memref<1024x128xbf16, #tpu.memory_space<vmem>>, vector<32x128xbf16>
    %cst_13 = arith.constant dense<0.000000e+00> : vector<2x128xf32>
    %21 = tpu.matmul %19, %20, %cst_13 {dimension_numbers = #tpu.dot_dimension_numbers<[1], [0], [0], [1], [0, 0, 1, 1], [], []>} : vector<2x32xbf16>, vector<32x128xbf16>, vector<2x128xf32> -> vector<2x128xf32>
    %22 = arith.addf %17, %21 : vector<2x128xf32>
    %c8 = arith.constant 8 : index
    %c0_14 = arith.constant 0 : index
    %23 = vector.load %arg3[%c8, %c0_14] : memref<13x128xf32, #tpu.memory_space<vmem>>, vector<1x128xf32>
    %24 = vector.broadcast %23 : vector<1x128xf32> to vector<2x128xf32>
    %25 = arith.addf %22, %24 : vector<2x128xf32>
    %cst_15 = arith.constant 0.000000e+00 : f32
    %26 = vector.broadcast %cst_15 : f32 to vector<2x128xf32>
    %27 = arith.cmpf ogt, %25, %26 : vector<2x128xf32>
    %cst_16 = arith.constant 0.000000e+00 : f32
    %28 = vector.broadcast %cst_16 : f32 to vector<2x128xf32>
    %29 = arith.minimumf %25, %28 : vector<2x128xf32>
    %30 = math.exp %29 : vector<2x128xf32>
    %cst_17 = arith.constant 1.000000e+00 : f32
    %31 = vector.broadcast %cst_17 : f32 to vector<2x128xf32>
    %32 = arith.subf %30, %31 : vector<2x128xf32>
    %33 = arith.select %27, %25, %32 : vector<2x128xi1>, vector<2x128xf32>
    %34 = arith.truncf %33 : vector<2x128xf32> to vector<2x128xbf16>
    %c384 = arith.constant 384 : index
    %c0_18 = arith.constant 0 : index
    %35 = vector.load %arg2[%c384, %c0_18] : memref<1024x128xbf16, #tpu.memory_space<vmem>>, vector<128x128xbf16>
    %cst_19 = arith.constant dense<0.000000e+00> : vector<2x128xf32>
    %36 = tpu.matmul %34, %35, %cst_19 {dimension_numbers = #tpu.dot_dimension_numbers<[1], [0], [0], [1], [0, 0, 1, 1], [], []>} : vector<2x128xbf16>, vector<128x128xbf16>, vector<2x128xf32> -> vector<2x128xf32>
    %c9 = arith.constant 9 : index
    %c0_20 = arith.constant 0 : index
    %37 = vector.load %arg3[%c9, %c0_20] : memref<13x128xf32, #tpu.memory_space<vmem>>, vector<1x128xf32>
    %38 = vector.broadcast %37 : vector<1x128xf32> to vector<2x128xf32>
    %39 = arith.addf %36, %38 : vector<2x128xf32>
    %cst_21 = arith.constant 0.000000e+00 : f32
    %40 = vector.broadcast %cst_21 : f32 to vector<2x128xf32>
    %41 = arith.maximumf %39, %40 : vector<2x128xf32>
    %42 = arith.truncf %41 : vector<2x128xf32> to vector<2x128xbf16>
    %c512 = arith.constant 512 : index
    %c0_22 = arith.constant 0 : index
    %43 = vector.load %arg2[%c512, %c0_22] : memref<1024x128xbf16, #tpu.memory_space<vmem>>, vector<128x128xbf16>
    %cst_23 = arith.constant dense<0.000000e+00> : vector<2x128xf32>
    %44 = tpu.matmul %42, %43, %cst_23 {dimension_numbers = #tpu.dot_dimension_numbers<[1], [0], [0], [1], [0, 0, 1, 1], [], []>} : vector<2x128xbf16>, vector<128x128xbf16>, vector<2x128xf32> -> vector<2x128xf32>
    %c10 = arith.constant 10 : index
    %c0_24 = arith.constant 0 : index
    %45 = vector.load %arg3[%c10, %c0_24] : memref<13x128xf32, #tpu.memory_space<vmem>>, vector<1x128xf32>
    %46 = vector.broadcast %45 : vector<1x128xf32> to vector<2x128xf32>
    %47 = arith.addf %44, %46 : vector<2x128xf32>
    %cst_25 = arith.constant 0.000000e+00 : f32
    %48 = vector.broadcast %cst_25 : f32 to vector<2x128xf32>
    %49 = arith.maximumf %47, %48 : vector<2x128xf32>
    %50 = arith.truncf %49 : vector<2x128xf32> to vector<2x128xbf16>
    %c640 = arith.constant 640 : index
    %c0_26 = arith.constant 0 : index
    %51 = vector.load %arg2[%c640, %c0_26] : memref<1024x128xbf16, #tpu.memory_space<vmem>>, vector<128x128xbf16>
    %cst_27 = arith.constant dense<0.000000e+00> : vector<2x128xf32>
    %52 = tpu.matmul %50, %51, %cst_27 {dimension_numbers = #tpu.dot_dimension_numbers<[1], [0], [0], [1], [0, 0, 1, 1], [], []>} : vector<2x128xbf16>, vector<128x128xbf16>, vector<2x128xf32> -> vector<2x128xf32>
    %c11 = arith.constant 11 : index
    %c0_28 = arith.constant 0 : index
    %53 = vector.load %arg3[%c11, %c0_28] : memref<13x128xf32, #tpu.memory_space<vmem>>, vector<1x128xf32>
    %54 = vector.broadcast %53 : vector<1x128xf32> to vector<2x128xf32>
    %55 = arith.addf %52, %54 : vector<2x128xf32>
    %cst_29 = arith.constant 0.000000e+00 : f32
    %56 = vector.broadcast %cst_29 : f32 to vector<2x128xf32>
    %57 = arith.maximumf %55, %56 : vector<2x128xf32>
    %58 = arith.truncf %57 : vector<2x128xf32> to vector<2x128xbf16>
    %c768 = arith.constant 768 : index
    %c0_30 = arith.constant 0 : index
    %59 = vector.load %arg2[%c768, %c0_30] : memref<1024x128xbf16, #tpu.memory_space<vmem>>, vector<128x128xbf16>
    %cst_31 = arith.constant dense<0.000000e+00> : vector<2x128xf32>
    %60 = tpu.matmul %58, %59, %cst_31 {dimension_numbers = #tpu.dot_dimension_numbers<[1], [0], [0], [1], [0, 0, 1, 1], [], []>} : vector<2x128xbf16>, vector<128x128xbf16>, vector<2x128xf32> -> vector<2x128xf32>
    %c12 = arith.constant 12 : index
    %c0_32 = arith.constant 0 : index
    %61 = vector.load %arg3[%c12, %c0_32] : memref<13x128xf32, #tpu.memory_space<vmem>>, vector<1x128xf32>
    %62 = vector.broadcast %61 : vector<1x128xf32> to vector<2x128xf32>
    %63 = arith.addf %60, %62 : vector<2x128xf32>
    %64 = arith.addf %63, %49 : vector<2x128xf32>
    %cst_33 = arith.constant 0.000000e+00 : f32
    %65 = vector.broadcast %cst_33 : f32 to vector<2x128xf32>
    %66 = arith.maximumf %64, %65 : vector<2x128xf32>
    %67 = arith.truncf %66 : vector<2x128xf32> to vector<2x128xbf16>
    %c896 = arith.constant 896 : index
    %c0_34 = arith.constant 0 : index
    %68 = vector.load %arg2[%c896, %c0_34] : memref<1024x128xbf16, #tpu.memory_space<vmem>>, vector<128x128xbf16>
    %cst_35 = arith.constant dense<0.000000e+00> : vector<2x128xf32>
    %69 = tpu.matmul %67, %68, %cst_35 {dimension_numbers = #tpu.dot_dimension_numbers<[1], [0], [0], [1], [0, 0, 1, 1], [], []>} : vector<2x128xbf16>, vector<128x128xbf16>, vector<2x128xf32> -> vector<2x128xf32>
    %c0_36 = arith.constant 0 : index
    %c0_37 = arith.constant 0 : index
    %70 = vector.load %arg4[%c0_36, %c0_37] : memref<2x128xf32, #tpu.memory_space<vmem>>, vector<2x128xf32>
    tpu.vector_store %arg4[%c0_36, %c0_37], %69 {strides = array<i32>} : memref<2x128xf32, #tpu.memory_space<vmem>>, vector<2x128xf32>,
    return
  }
}

</mosaic_0001>

<bundles_post_ra>
// kernel: _lambda_.1
= control target key start
LH: loop header
LB: loop body
LE: loop exit
PB: predicated region body
PF: predicated region fallthrough
CT: control target
= control target key end

     0   :  { %v1606_v1 = vmov 0   ;;  %vm142_vm0 = vcmask 785408   ;;  %s1972_s0 = inlined_call_operand.vmem [shape: f32[14,224], index: 0, kind: input, shape index: {}]   ;;  %s1973_s1 = inlined_call_operand.vmem [shape: f32[2,32], index: 1, kind: input, shape index: {}]   ;;  %s1974_s2 = inlined_call_operand.vmem [shape: bf16[1024,128], index: 2, kind: input, shape index: {}]   ;;  %s1975_s3 = inlined_call_operand.vmem [shape: f32[13,128], index: 3, kind: input, shape index: {}]   ;;  %s1976_s4 = inlined_call_operand.hbm [shape: f32[2,128], index: 4, kind: output, shape index: {}]  }
   0x1   :  { %v1515_v0 = vld [vmem:[%s1974_s2] sm:$0xff]   ;;  %146 = vmatprep.subr.bf16.mxu0 %v1606_v1  ;;  %v1516_v2 = vld [vmem:[%s1974_s2 + $0x8] sm:$0xff]   ;;  %v1517_v3 = vld [vmem:[%s1974_s2 + $0x10] sm:$0xff]  }
   0x2   :  { %147 = vmatpush1.bf16.msra.mxu0 %v1515_v0  ;;  %v1518_v4 = vld [vmem:[%s1974_s2 + $0x18] sm:$0xff]   ;;  %v1519_v5 = vld [vmem:[%s1974_s2 + $0x20] sm:$0xff]   ;;  %v20_v6 = vld [vmem:[%s1972_s0 + $0x8] sm:$0xff] }
   0x3   :  { %148 = vmatprep.subr.bf16.mxu0 %v1606_v1  ;;  %v22_v7 = vld [vmem:[%s1972_s0 + $0x18] sm:$0x3f]  ;;  %v1520_v9 = vld [vmem:[%s1974_s2 + $0x28] sm:$0xff]   ;;  %v1521_v10 = vld [vmem:[%s1974_s2 + $0x30] sm:$0xff]  }
   0x4   :  { %v24_v8 = vpack.c.bf16 %v22_v7, %v20_v6  ;;  %v1522_v11 = vld [vmem:[%s1974_s2 + $0x38] sm:$0xff]   ;;  %v1523_v12 = vld [vmem:[%s1974_s2 + $0x40] sm:$0xff]   ;;  %v1524_v13 = vld [vmem:[%s1974_s2 + $0x48] sm:$0xff]  }
   0x5   :  { %v1525_v14 = vld [vmem:[%s1974_s2 + $0x50] sm:$0xff]   ;;  %v1526_v15 = vld [vmem:[%s1974_s2 + $0x58] sm:$0xff]   ;;  %v1527_v16 = vld [vmem:[%s1974_s2 + $0x60] sm:$0xff]  }
   0x6   :  { %149 = vmatpush1.bf16.msra.mxu0 %v1516_v2  ;;  %1267 = vmatprep.mubr.msk.bf16.mxu0 %vm142_vm0, %v24_v8 }
   0x7   :  { %150 = vmatprep.subr.bf16.mxu0 %v1606_v1 }
   0xa   :  { %151 = vmatpush1.bf16.msra.mxu0 %v1517_v3 }
   0xb   :  { %152 = vmatprep.subr.bf16.mxu0 %v1606_v1 }
   0xe   :  { %153 = vmatpush1.bf16.msra.mxu0 %v1518_v4 }
   0xf   :  { %154 = vmatprep.subr.bf16.mxu0 %v1606_v1 }
  0x12   :  { %155 = vmatpush1.bf16.msra.mxu0 %v1519_v5 }
  0x13   :  { %156 = vmatprep.subr.bf16.mxu0 %v1606_v1 }
  0x16   :  { %157 = vmatpush1.bf16.msra.mxu0 %v1520_v9 }
  0x17   :  { %158 = vmatprep.subr.bf16.mxu0 %v1606_v1 }
  0x1a   :  { %159 = vmatpush1.bf16.msra.mxu0 %v1521_v10 }
  0x1b   :  { %160 = vmatprep.subr.bf16.mxu0 %v1606_v1 }
  0x1e   :  { %161 = vmatpush1.bf16.msra.mxu0 %v1522_v11 }
  0x1f   :  { %162 = vmatprep.subr.bf16.mxu0 %v1606_v1 }
  0x22   :  { %163 = vmatpush1.bf16.msra.mxu0 %v1523_v12 }
  0x23   :  { %164 = vmatprep.subr.bf16.mxu0 %v1606_v1 }
  0x26   :  { %165 = vmatpush1.bf16.msra.mxu0 %v1524_v13 }
  0x27   :  { %166 = vmatprep.subr.bf16.mxu0 %v1606_v1 }
  0x2a   :  { %167 = vmatpush1.bf16.msra.mxu0 %v1525_v14 }
  0x2b   :  { %168 = vmatprep.subr.bf16.mxu0 %v1606_v1 }
  0x2e   :  { %169 = vmatpush1.bf16.msra.mxu0 %v1526_v15 }
  0x2f   :  { %170 = vmatprep.subr.bf16.mxu0 %v1606_v1 }
  0x30   :  { %9 = vsyncpa [#allocation3], 0  ;;  %v1528_v17 = vld [vmem:[%s1974_s2 + $0x68] sm:$0xff]   ;;  %v19_v18 = vld [vmem:[%s1972_s0] sm:$0xff]  ;;  %v1607_v22 = vmov 0.0   ;;  %vm1608_vm1 = vmmov 0   ;;  %v195_v36 = vlaneseq }
  0x31   :  { %v21_v19 = vld [vmem:[%s1972_s0 + $0x10] sm:$0x3f]  ;;  %1390 = vmatprep.subr.bf16.mxu1 %v1607_v22  ;;  %v1531_v23 = vld [vmem:[%s1974_s2 + $0x78] sm:$0xff]   ;;  %v1532_v24 = vld [vmem:[%s1974_s2 + $0x80] sm:$0xff]   ;;  %1406 = vmatprep.mubr.msk.bf16.mxu1 %vm1608_vm1, %v1607_v22  ;;  %vm535_vm2 = vcmask 261120   ;;  %vm484_vm3 = vcmask 1046528  }
  0x32   :  { %171 = vmatpush1.bf16.msra.mxu0 %v1527_v16  ;;  %v23_v20 = vpack.c.bf16 %v21_v19, %v19_v18  ;;  %v1530_v21 = vld [vmem:[%s1974_s2 + $0x70] sm:$0xff]   ;;  %v1533_v26 = vld [vmem:[%s1974_s2 + $0x88] sm:$0xff]   ;;  %v1538_v27 = vld [vmem:[%s1974_s2 + $0xb8] sm:$0xff]   ;;  %v1609_v34 = vmov 1966171168   ;;  %v196_v38 = vshrl.u32 %v195_v36, 7 }
  0x33   :  { %172 = vmatprep.subr.bf16.mxu0 %v1606_v1  ;;  %1391 = vmatpush3.bf16.msra.mxu1 %v1530_v21  ;;  %v1536_v25 = vld [vmem:[%s1974_s2 + $0xb0] sm:$0xff]   ;;  %v517_v28 = vld [vmem:[%s1973_s1] sm:$0x3]  ;;  %v1535_v31 = vld [vmem:[%s1974_s2 + $0x98] sm:$0xff]   ;;  %v193_v35 = vunpack.c.l.s4 %v1609_v34  ;;  %vm583_vm4 = vcmask 1041409   ;;  %s1610_s0 = smov [#allocation2]  }
  0x34   :  { %1392 = vmatprep.subr.bf16.mxu1 %v1607_v22  ;;  %v518_v29 = vpack.c.bf16 %v517_v28, %v517_v28  ;;  %v1534_v30 = vld [vmem:[%s1974_s2 + $0x90] sm:$0xff]   ;;  %v1537_v32 = vld [vmem:[%s1974_s2 + $0xa0] sm:$0xff]   ;;  %v1539_v33 = vld [vmem:[%s1974_s2 + $0xa8] sm:$0xff]   ;;  %s1244_s29 = sshll.u32 %s1610_s0, 4  ;;  %s1245_s29 = int_to_ptr.vmem [resolvable:$true] %s1244_s29 }
  0x35   :  { %v194_v37 = vunpack.c.0.s8 %v193_v35  ;;  %v301_v40 = vld [vmem:[%s1975_s3] sm:$0x7f]  ;;  %v1252_v43 = vld [vmem:[%s1975_s3 + $0x7] ss:$0 sm:$0xff]  ;;  %p1587_p1 = scmp.lt.s32.totalorder %s1245_s29, %s1245_s29 }
  0x36   :  { %173 = vmatpush1.bf16.msra.mxu0 %v1528_v17  ;;  %v303_v41 = vcombine.high %v301_v40, %v301_v40 }
  0x37   :  { %1382 = vmatprep.subr.bf16.mxu0 %v1607_v22  ;;  %1393 = vmatpush3.bf16.msra.mxu1 %v1531_v23  ;;  %v1741_v39 = vsub.s32 %v194_v37, %v196_v38 }
  0x38   :  { %1394 = vmatprep.subr.bf16.mxu1 %v1607_v22 }
  0x39   :  { %179 = vmatmul.mubr.bf16.vlgmr.msra.gmra.mrb[0].mxu0 %v23_v20  ;;  %v310_v42 = vrot.slane %v301_v40, %v1741_v39  ;;  %v317_v45 = vrot.slane %v303_v41, %v1741_v39 }
  0x3a   :  { %1386 = vmatprep.mubr.msk.bf16.mxu0 %vm1608_vm1, %v1607_v22  ;;  %1383 = vmatpush3.bf16.msra.mxu0 %v1536_v25 }
  0x3b   :  { %1395 = vmatpush3.bf16.msra.mxu1 %v1532_v24  ;;  %1384 = vmatprep.subr.bf16.mxu0 %v1607_v22  ;;  %v318_v46 = vcombine.high %v310_v42, %v310_v42  ;;  %v326_v49 = vrot.slane %v310_v42, %v1741_v39  ;;  %v319_v54 = vcombine.high %v317_v45, %v317_v45 }
  0x3c   :  { %1396 = vmatprep.subr.bf16.mxu1 %v1607_v22  ;;  %v333_v55 = vrot.slane %v317_v45, %v1741_v39 }
  0x3d   :  { %v340_v56 = vrot.slane %v318_v46, %v1741_v39  ;;  %v348_v60 = vcombine.high %v326_v49, %v326_v49  ;;  %v347_v1 = vrot.slane %v319_v54, %v1741_v39 }
  0x3e   :  { %1385 = vmatpush3.bf16.msra.mxu0 %v1538_v27  ;;  %v349_v2 = vcombine.high %v333_v55, %v333_v55 }
  0x3f   :  { %1397 = vmatpush3.bf16.msra.mxu1 %v1533_v26  ;;  %1430 = vmatprep.subr.bf16.mxu0 %v1607_v22  ;;  %v350_v3 = vcombine.high %v340_v56, %v340_v56 }
  0x40   :  { %1398 = vmatprep.subr.bf16.mxu1 %v1607_v22 }
  0x41   :  { %1387 = vmatmul.mubr.msk.bf16.vlgmr.msra.gmra.mrb[4].mxu0 %vm535_vm2, %v518_v29 }
  0x42   :  { %1446 = vmatprep.mubr.msk.bf16.mxu0 %vm1608_vm1, %v1607_v22 }
  0x43   :  { %1399 = vmatpush3.bf16.msra.mxu1 %v1534_v30 }
  0x44   :  { %1400 = vmatprep.subr.bf16.mxu1 %v1607_v22 }
  0x47   :  { %1401 = vmatpush3.bf16.msra.mxu1 %v1535_v31 }
  0x48   :  { %1402 = vmatprep.subr.bf16.mxu1 %v1607_v22 }
  0x4b   :  { %1403 = vmatpush3.bf16.msra.mxu1 %v1537_v32 }
  0x4c   :  { %1404 = vmatprep.subr.bf16.mxu1 %v1607_v22 }
  0x4f   :  { %1405 = vmatpush3.bf16.msra.mxu1 %v1539_v33 }
  0x50   :  { %1410 = vmatprep.subr.bf16.mxu1 %v1607_v22 }
 0x10c   :  { %v180_v44 = vpop.f32.mrb[0].mxu0 }
 0x10d   :  { %v181_v47 = vadd.f32 %v1252_v43, %v180_v44  ;;  %v182_v48 = vpop.f32.mrb[1].mxu0 }
 0x10e   :  { %v183_v50 = vpop.f32.mrb[2].mxu0 }
 0x10f   :  { %v187_v51 = vmax.f32 %v181_v47, 0.0  ;;  %v184_v52 = vadd.f32 %v1252_v43, %v183_v50  ;;  %v185_v53 = vpop.f32.mrb[3].mxu0 }
 0x111   :  { %v191_v57 = vcombine.high %v187_v51, %v187_v51  ;;  %v198_v58 = vrot.slane %v187_v51, %v1741_v39  ;;  %v188_v59 = vmax.f32 %v184_v52, 0.0 }
 0x113   :  { %v205_v61 = vrot.slane %v191_v57, %v1741_v39  ;;  %v206_v62 = vcombine.high %v198_v58, %v198_v58  ;;  %v214_v63 = vrot.slane %v198_v58, %v1741_v39  ;;  %v240_v0 = vcombine.high %v188_v59, %v188_v59 }
 0x114   :  { %v247_v4 = vrot.slane %v188_v59, %v1741_v39 }
 0x115   :  { %v207_v5 = vcombine.high %v205_v61, %v205_v61  ;;  %v221_v6 = vrot.slane %v205_v61, %v1741_v39  ;;  %v228_v7 = vrot.slane %v206_v62, %v1741_v39  ;;  %v236_v8 = vcombine.high %v214_v63, %v214_v63 }
 0x116   :  { %v358_v9 = vmul.f32 %v326_v49, %v214_v63  ;;  %v254_v10 = vrot.slane %v240_v0, %v1741_v39  ;;  %v255_v11 = vcombine.high %v247_v4, %v247_v4  ;;  %v263_v12 = vrot.slane %v247_v4, %v1741_v39 }
 0x117   :  { %v235_v13 = vrot.slane %v207_v5, %v1741_v39  ;;  %v237_v14 = vcombine.high %v221_v6, %v221_v6  ;;  %v238_v15 = vcombine.high %v228_v7, %v228_v7  ;;  %v359_v16 = vmul.f32 %v340_v56, %v228_v7 }
 0x118   :  { %v360_v17 = vmul.f32 %v348_v60, %v236_v8  ;;  %v362_v18 = vmul.f32 %v333_v55, %v221_v6  ;;  %v256_v19 = vcombine.high %v254_v10, %v254_v10  ;;  %v270_v20 = vrot.slane %v254_v10, %v1741_v39 }
 0x119   :  { %v239_v21 = vcombine.high %v235_v13, %v235_v13  ;;  %v361_v23 = vmul.f32 %v350_v3, %v238_v15  ;;  %v363_v24 = vmul.f32 %v347_v1, %v235_v13  ;;  %v364_v25 = vmul.f32 %v349_v2, %v237_v14 }
 0x11a   :  { %v386_v26 = vcombine.low %v358_v9, %v359_v16  ;;  %v277_v27 = vrot.slane %v255_v11, %v1741_v39  ;;  %v284_v28 = vrot.slane %v256_v19, %v1741_v39  ;;  %v285_v29 = vcombine.high %v263_v12, %v263_v12  ;;  %v1540_v16 = vld [vmem:[%s1974_s2 + $0xc0] sm:$0xff]   ;;  %v573_v19 = vpop.f32.mrb[4].mxu0 }
 0x11b   :  { %v387_v30 = vcombine.low %v360_v17, %v361_v23  ;;  %v388_v31 = vcombine.low %v362_v18, %v363_v24  ;;  %v365_v32 = vmul.f32 %v326_v49, %v239_v21  ;;  %v416_v33 = vrot.slane %v364_v25, %v1741_v39  ;;  %v1541_v18 = vld [vmem:[%s1974_s2 + $0xc8] sm:$0xff]   ;;  %v1542_v24 = vld [vmem:[%s1974_s2 + $0xd0] sm:$0xff]   ;;  %v1543_v25 = vld [vmem:[%s1974_s2 + $0xd8] sm:$0xff]  }
 0x11c   :  { %v286_v34 = vcombine.high %v277_v27, %v277_v27  ;;  %v366_v35 = vmul.f32 %v340_v56, %v263_v12  ;;  %v367_v36 = vmul.f32 %v348_v60, %v277_v27  ;;  %v395_v37 = vrot.slane %v386_v26, %v1741_v39  ;;  %v1544_v26 = vld [vmem:[%s1974_s2 + $0xe0] sm:$0xff]   ;;  %v1545_v27 = vld [vmem:[%s1974_s2 + $0xe8] sm:$0xff]  }
 0x11d   :  { %v402_v38 = vrot.slane %v387_v30, %v1741_v39  ;;  %v409_v40 = vrot.slane %v388_v31, %v1741_v39  ;;  %v368_v41 = vmul.f32 %v350_v3, %v285_v29  ;;  %v370_v43 = vmul.f32 %v347_v1, %v270_v20  ;;  %v1388_v20 = vpop.f32.mrb[5].mxu0  ;;  %v1547_v29 = vld [vmem:[%s1974_s2 + $0xf8] sm:$0xff]   ;;  %v1548_v30 = vld [vmem:[%s1974_s2 + $0x100] sm:$0xff]   ;;  %v1549_v31 = vld [vmem:[%s1974_s2 + $0x108] sm:$0xff]  }
 0x11e   :  { %v369_v42 = vmul.f32 %v333_v55, %v286_v34  ;;  %v371_v44 = vmul.f32 %v349_v2, %v284_v28  ;;  %v434_v45 = vcombine.low %v365_v32, %v366_v35  ;;  %v576_v21 = vpop.f32.mrb[6].mxu0  ;;  %v1546_v28 = vld [vmem:[%s1974_s2 + $0xf0] sm:$0xff]   ;;  %1431 = vmatpush3.bf16.msra.mxu0 %v1548_v30  ;;  %v1552_v34 = vld [vmem:[%s1974_s2 + $0x120] sm:$0xff]   ;;  %v1553_v35 = vld [vmem:[%s1974_s2 + $0x128] sm:$0xff]  }
 0x11f   :  { %v417_v46 = vcombine.low %v395_v37, %v402_v38  ;;  %v418_v47 = vcombine.low %v409_v40, %v416_v33  ;;  %v435_v48 = vcombine.low %v367_v36, %v368_v41  ;;  %v1389_v23 = vpop.f32.mrb[7].mxu0  ;;  %1432 = vmatprep.subr.bf16.mxu0 %v1607_v22  ;;  %v1550_v32 = vld [vmem:[%s1974_s2 + $0x110] sm:$0xff]   ;;  %v1551_v33 = vld [vmem:[%s1974_s2 + $0x118] sm:$0xff]   ;;  %v1279_v37 = vld [vmem:[%s1975_s3 + $0x8] ss:$0 sm:$0xff] }
 0x120   :  { %v436_v49 = vcombine.low %v369_v42, %v370_v43  ;;  %v443_v50 = vrot.slane %v434_v45, %v1741_v39  ;;  %v464_v56 = vrot.slane %v371_v44, %v1741_v39  ;;  %v1573_v20 = vld [vmem:[%s1974_s2 + $0x1c8] sm:$0xff]   ;;  %v1574_v21 = vld [vmem:[%s1974_s2 + $0x1d0] sm:$0xff]   ;;  %v1575_v23 = vld [vmem:[%s1974_s2 + $0x1d8] sm:$0xff]  }
 0x121   :  { %v425_v51 = vrot.slane %v417_v46, %v1741_v39  ;;  %v432_v52 = vrot.slane %v418_v47, %v1741_v39  ;;  %v450_v53 = vrot.slane %v435_v48, %v1741_v39 }
 0x122   :  { %v457_v54 = vrot.slane %v436_v49, %v1741_v39  ;;  %1433 = vmatpush3.bf16.msra.mxu0 %v1549_v31 }
 0x123   :  { %v465_v55 = vcombine.low %v443_v50, %v450_v53  ;;  %v433_v57 = vcombine.low %v425_v51, %v432_v52  ;;  %1434 = vmatprep.subr.bf16.mxu0 %v1607_v22  ;;  %v1554_v50 = vld [vmem:[%s1974_s2 + $0x130] sm:$0xff]   ;;  %v1555_v51 = vld [vmem:[%s1974_s2 + $0x138] sm:$0xff]   ;;  %v1556_v52 = vld [vmem:[%s1974_s2 + $0x140] sm:$0xff]  }
 0x124   :  { %v466_v58 = vcombine.low %v457_v54, %v464_v56  ;;  %v1557_v53 = vld [vmem:[%s1974_s2 + $0x148] sm:$0xff]   ;;  %v1558_v54 = vld [vmem:[%s1974_s2 + $0x150] sm:$0xff]   ;;  %v1559_v56 = vld [vmem:[%s1974_s2 + $0x158] sm:$0xff]  }
 0x125   :  { %v473_v59 = vrot.slane %v465_v55, %v1741_v39  ;;  %v485_v60 = vsel %vm484_vm3, %v433_v57, -inf  ;;  %v1560_v55 = vld [vmem:[%s1974_s2 + $0x160] sm:$0xff]   ;;  %v1561_v57 = vld [vmem:[%s1974_s2 + $0x168] sm:$0xff]  }
 0x126   :  { %v480_v61 = vrot.slane %v466_v58, %v1741_v39  ;;  %v486_v62 = vrot.slane %v485_v60, 4  ;;  %1435 = vmatpush3.bf16.msra.mxu0 %v1550_v32  ;;  %v1281_v58 = vld [vmem:[%s1975_s3 + $0x9] ss:$0 sm:$0xff] }
 0x127   :  { %1436 = vmatprep.subr.bf16.mxu0 %v1607_v22 }
 0x128   :  { %v481_v63 = vcombine.low %v473_v59, %v480_v61  ;;  %v487_v0 = vmax.f32 %v485_v60, %v486_v62 }
 0x12a   :  { %v488_v1 = vrot.slane %v487_v0, 2  ;;  %v492_v2 = vsel %vm484_vm3, %v481_v63, -inf  ;;  %1437 = vmatpush3.bf16.msra.mxu0 %v1551_v33 }
 0x12b   :  { %v493_v3 = vrot.slane %v492_v2, 4  ;;  %1438 = vmatprep.subr.bf16.mxu0 %v1607_v22 }
 0x12c   :  { %v489_v4 = vmax.f32 %v487_v0, %v488_v1 }
 0x12d   :  { %v494_v5 = vmax.f32 %v492_v2, %v493_v3  ;;  %v1562_v2 = vld [vmem:[%s1974_s2 + $0x170] sm:$0xff]   ;;  %v1563_v3 = vld [vmem:[%s1974_s2 + $0x178] sm:$0xff]  }
 0x12e   :  { %v490_v6 = vrot.slane %v489_v4, 1  ;;  %1439 = vmatpush3.bf16.msra.mxu0 %v1552_v34  ;;  %v1578_v34 = vld [vmem:[%s1974_s2 + $0x1f0] sm:$0xff]  }
 0x12f   :  { %v495_v7 = vrot.slane %v494_v5, 2  ;;  %1440 = vmatprep.subr.bf16.mxu0 %v1607_v22 }
 0x130   :  { %v491_v8 = vmax.f32 %v489_v4, %v490_v6  ;;  %v1564_v4 = vld [vmem:[%s1974_s2 + $0x180] sm:$0xff]   ;;  %v1566_v6 = vld [vmem:[%s1974_s2 + $0x190] sm:$0xff]  }
 0x131   :  { %v496_v9 = vmax.f32 %v494_v5, %v495_v7  ;;  %v1565_v5 = vld [vmem:[%s1974_s2 + $0x188] sm:$0xff]   ;;  %v1567_v7 = vld [vmem:[%s1974_s2 + $0x198] sm:$0xff]  }
 0x132   :  { %v499_v12 = vpack.c.bf16 %v491_v8, %v491_v8  ;;  %1441 = vmatpush3.bf16.msra.mxu0 %v1553_v35  ;;  %v1568_v8 = vld [vmem:[%s1974_s2 + $0x1a0] sm:$0xff]   ;;  %v1579_v35 = vld [vmem:[%s1974_s2 + $0x1f8] sm:$0xff]  }
 0x133   :  { %v497_v10 = vrot.slane %v496_v9, 1  ;;  %1442 = vmatprep.subr.bf16.mxu0 %v1607_v22 }
 0x134   :  { %v581_v14 = vunpack.c.l.b16 %v499_v12 }
 0x135   :  { %v498_v11 = vmax.f32 %v496_v9, %v497_v10  ;;  %v1569_v9 = vld [vmem:[%s1974_s2 + $0x1a8] sm:$0xff]  }
 0x136   :  { %1443 = vmatpush3.bf16.msra.mxu0 %v1554_v50  ;;  %v1290_v10 = vld [vmem:[%s1975_s3 + $0xa] ss:$0 sm:$0xff] }
 0x137   :  { %v500_v13 = vpack.c.bf16 %v498_v11, %v498_v11  ;;  %1444 = vmatprep.subr.bf16.mxu0 %v1607_v22 }
 0x139   :  { %v582_v15 = vunpack.c.l.b16 %v500_v13 }
 0x13a   :  { %1445 = vmatpush3.bf16.msra.mxu0 %v1555_v51 }
 0x13b   :  { %v584_v39 = vsel %vm583_vm4, %v582_v15, %v581_v14  ;;  %1470 = vmatprep.subr.bf16.mxu0 %v1607_v22 }
 0x13c   :  { %v585_v17 = vpack.c.b16 %v584_v39, %v584_v39 }
 0x13e   :  { %1407 = vmatmul.mubr.bf16.vlgmr.msra.gmra.mrb[0].mxu1 %v585_v17  ;;  %v1570_v17 = vld [vmem:[%s1974_s2 + $0x1b0] sm:$0xff]  }
 0x13f   :  { %1411 = vmatpush3.bf16.msra.mxu1 %v1540_v16  ;;  %1426 = vmatprep.mubr.msk.bf16.mxu1 %vm1608_vm1, %v1607_v22 }
 0x140   :  { %1412 = vmatprep.subr.bf16.mxu1 %v1607_v22 }
 0x143   :  { %1413 = vmatpush3.bf16.msra.mxu1 %v1541_v18  ;;  %v1571_v18 = vld [vmem:[%s1974_s2 + $0x1b8] sm:$0xff]  }
 0x144   :  { %1414 = vmatprep.subr.bf16.mxu1 %v1607_v22 }
 0x147   :  { %1415 = vmatpush3.bf16.msra.mxu1 %v1542_v24  ;;  %v1576_v24 = vld [vmem:[%s1974_s2 + $0x1e0] sm:$0xff]  }
 0x148   :  { %1416 = vmatprep.subr.bf16.mxu1 %v1607_v22 }
 0x14b   :  { %1417 = vmatpush3.bf16.msra.mxu1 %v1543_v25  ;;  %v1577_v25 = vld [vmem:[%s1974_s2 + $0x1e8] sm:$0xff]  }
 0x14c   :  { %1418 = vmatprep.subr.bf16.mxu1 %v1607_v22 }
 0x14f   :  { %1419 = vmatpush3.bf16.msra.mxu1 %v1544_v26  ;;  %v1299_v26 = vld [vmem:[%s1975_s3 + $0xb] ss:$0 sm:$0xff] }
 0x150   :  { %1420 = vmatprep.subr.bf16.mxu1 %v1607_v22 }
 0x153   :  { %1421 = vmatpush3.bf16.msra.mxu1 %v1545_v27 }
 0x154   :  { %1422 = vmatprep.subr.bf16.mxu1 %v1607_v22 }
 0x157   :  { %1423 = vmatpush3.bf16.msra.mxu1 %v1546_v28 }
 0x158   :  { %1424 = vmatprep.subr.bf16.mxu1 %v1607_v22 }
 0x15b   :  { %1425 = vmatpush3.bf16.msra.mxu1 %v1547_v29 }
 0x15c   :  { %1450 = vmatprep.subr.bf16.mxu1 %v1607_v22 }
 0x211   :  { %v669_v36 = vpop.f32.mrb[0].mxu1 }
 0x212   :  { %v670_v38 = vadd.f32 %v669_v36, %v573_v19  ;;  %v1408_v40 = vpop.f32.mrb[1].mxu1  ;;  %v1572_v19 = vld [vmem:[%s1974_s2 + $0x1c0] sm:$0xff]   ;;  %v1308_v36 = vld [vmem:[%s1975_s3 + $0xc] ss:$0 sm:$0xff]  ;;  %s1582_s2 = scalar_lea.vmem %s1245_s29, 32 }
 0x213   :  { %v672_v41 = vpop.f32.mrb[2].mxu1  ;;  %p1583_p0 = scmp.ne.s32.totalorder %s1245_s29, %s1582_s2  ;;  %p1588_p2 = scmp.lt.s32.totalorder %s1582_s2, %s1582_s2 }
 0x214   :  { %v680_v42 = vadd.f32 %v1279_v37, %v670_v38  ;;  %v1409_v43 = vpop.f32.mrb[3].mxu1 }
 0x215   :  { %p1589_p3 = por %p1588_p2, %p1587_p1 }
 0x216   :  { %v682_v44 = vmin.f32 %v680_v42, 0.0  ;;  %vm681_vm5 = vcmp.gt.f32.partialorder %v680_v42, 0.0 }
 0x217   :  { %p1590_p4 = pnand %p1589_p3, %p1583_p0 }
 0x218   :  { %v683_v45 = vmul.f32 1.442695, %v682_v44 }
 0x21a   :  { %1580 = vpow2.f32 %v683_v45 }
 0x224   :  { %v1581_v46 = vpop.eup %1580 }
 0x225   :  { %v1280_v47 = vadd.f32 -1.0, %v1581_v46 }
 0x227   :  { %v686_v48 = vsel %vm681_vm5, %v680_v42, %v1280_v47 }
 0x228   :  { %v687_v49 = vpack.c.bf16 %v686_v48, %v686_v48 }
 0x22a   :  { %1427 = vmatmul.mubr.bf16.vlgmr.msra.gmra.mrb[4].mxu1 %v687_v49 }
 0x22b   :  { %1466 = vmatprep.mubr.msk.bf16.mxu1 %vm1608_vm1, %v1607_v22  ;;  %1451 = vmatpush3.bf16.msra.mxu1 %v1556_v52 }
 0x22c   :  { %1452 = vmatprep.subr.bf16.mxu1 %v1607_v22 }
 0x22f   :  { %1453 = vmatpush3.bf16.msra.mxu1 %v1557_v53 }
 0x230   :  { %1454 = vmatprep.subr.bf16.mxu1 %v1607_v22 }
 0x233   :  { %1455 = vmatpush3.bf16.msra.mxu1 %v1558_v54 }
 0x234   :  { %1456 = vmatprep.subr.bf16.mxu1 %v1607_v22 }
 0x237   :  { %1457 = vmatpush3.bf16.msra.mxu1 %v1559_v56 }
 0x238   :  { %1458 = vmatprep.subr.bf16.mxu1 %v1607_v22 }
 0x23b   :  { %1459 = vmatpush3.bf16.msra.mxu1 %v1560_v55 }
 0x23c   :  { %1460 = vmatprep.subr.bf16.mxu1 %v1607_v22 }
 0x23f   :  { %1461 = vmatpush3.bf16.msra.mxu1 %v1561_v57 }
 0x240   :  { %1462 = vmatprep.subr.bf16.mxu1 %v1607_v22 }
 0x243   :  { %1463 = vmatpush3.bf16.msra.mxu1 %v1562_v2 }
 0x244   :  { %1464 = vmatprep.subr.bf16.mxu1 %v1607_v22 }
 0x247   :  { %1465 = vmatpush3.bf16.msra.mxu1 %v1563_v3 }
 0x248   :  { %1490 = vmatprep.subr.bf16.mxu1 %v1607_v22 }
 0x2fd   :  { %v791_v59 = vpop.f32.mrb[4].mxu1 }
 0x2fe   :  { %v792_v60 = vadd.f32 %v1281_v58, %v791_v59  ;;  %v1428_v61 = vpop.f32.mrb[5].mxu1 }
 0x2ff   :  { %v794_v62 = vpop.f32.mrb[6].mxu1 }
 0x300   :  { %v797_v63 = vmax.f32 %v792_v60, 0.0  ;;  %v1429_v0 = vpop.f32.mrb[7].mxu1 }
 0x302   :  { %v798_v1 = vpack.c.bf16 %v797_v63, %v797_v63 }
 0x304   :  { %1447 = vmatmul.mubr.bf16.vlgmr.msra.gmra.mrb[8].mxu0 %v798_v1 }
 0x305   :  { %1486 = vmatprep.mubr.msk.bf16.mxu0 %vm1608_vm1, %v1607_v22  ;;  %1471 = vmatpush3.bf16.msra.mxu0 %v1564_v4 }
 0x306   :  { %1472 = vmatprep.subr.bf16.mxu0 %v1607_v22 }
 0x309   :  { %1473 = vmatpush3.bf16.msra.mxu0 %v1565_v5 }
 0x30a   :  { %1474 = vmatprep.subr.bf16.mxu0 %v1607_v22 }
 0x30d   :  { %1475 = vmatpush3.bf16.msra.mxu0 %v1566_v6 }
 0x30e   :  { %1476 = vmatprep.subr.bf16.mxu0 %v1607_v22 }
 0x311   :  { %1477 = vmatpush3.bf16.msra.mxu0 %v1567_v7 }
 0x312   :  { %1478 = vmatprep.subr.bf16.mxu0 %v1607_v22 }
 0x315   :  { %1479 = vmatpush3.bf16.msra.mxu0 %v1568_v8 }
 0x316   :  { %1480 = vmatprep.subr.bf16.mxu0 %v1607_v22 }
 0x319   :  { %1481 = vmatpush3.bf16.msra.mxu0 %v1569_v9 }
 0x31a   :  { %1482 = vmatprep.subr.bf16.mxu0 %v1607_v22 }
 0x31d   :  { %1483 = vmatpush3.bf16.msra.mxu0 %v1570_v17 }
 0x31e   :  { %1484 = vmatprep.subr.bf16.mxu0 %v1607_v22 }
 0x321   :  { %1485 = vmatpush3.bf16.msra.mxu0 %v1571_v18 }
 0x3d7   :  { %v902_v11 = vpop.f32.mrb[8].mxu0 }
 0x3d8   :  { %v903_v12 = vadd.f32 %v1290_v10, %v902_v11  ;;  %v1448_v13 = vpop.f32.mrb[9].mxu0 }
 0x3d9   :  { %v905_v14 = vpop.f32.mrb[10].mxu0 }
 0x3da   :  { %v908_v15 = vmax.f32 %v903_v12, 0.0  ;;  %v1449_v39 = vpop.f32.mrb[11].mxu0 }
 0x3dc   :  { %v909_v16 = vpack.c.bf16 %v908_v15, %v908_v15 }
 0x3de   :  { %1467 = vmatmul.mubr.bf16.vlgmr.msra.gmra.mrb[8].mxu1 %v909_v16 }
 0x3df   :  { %1506 = vmatprep.mubr.msk.bf16.mxu1 %vm1608_vm1, %v1607_v22  ;;  %1491 = vmatpush3.bf16.msra.mxu1 %v1572_v19 }
 0x3e0   :  { %1492 = vmatprep.subr.bf16.mxu1 %v1607_v22 }
 0x3e3   :  { %1493 = vmatpush3.bf16.msra.mxu1 %v1573_v20 }
 0x3e4   :  { %1494 = vmatprep.subr.bf16.mxu1 %v1607_v22 }
 0x3e7   :  { %1495 = vmatpush3.bf16.msra.mxu1 %v1574_v21 }
 0x3e8   :  { %1496 = vmatprep.subr.bf16.mxu1 %v1607_v22 }
 0x3eb   :  { %1497 = vmatpush3.bf16.msra.mxu1 %v1575_v23 }
 0x3ec   :  { %1498 = vmatprep.subr.bf16.mxu1 %v1607_v22 }
 0x3ef   :  { %1499 = vmatpush3.bf16.msra.mxu1 %v1576_v24 }
 0x3f0   :  { %1500 = vmatprep.subr.bf16.mxu1 %v1607_v22 }
 0x3f3   :  { %1501 = vmatpush3.bf16.msra.mxu1 %v1577_v25 }
 0x3f4   :  { %1502 = vmatprep.subr.bf16.mxu1 %v1607_v22 }
 0x3f7   :  { %1503 = vmatpush3.bf16.msra.mxu1 %v1578_v34 }
 0x3f8   :  { %1504 = vmatprep.subr.bf16.mxu1 %v1607_v22 }
 0x3fb   :  { %1505 = vmatpush3.bf16.msra.mxu1 %v1579_v35 }
 0x4b1   :  { %v1013_v27 = vpop.f32.mrb[8].mxu1 }
 0x4b2   :  { %v1014_v28 = vadd.f32 %v1299_v26, %v1013_v27  ;;  %v1468_v29 = vpop.f32.mrb[9].mxu1 }
 0x4b3   :  { %v1016_v30 = vpop.f32.mrb[10].mxu1 }
 0x4b4   :  { %v1019_v31 = vmax.f32 %v1014_v28, 0.0  ;;  %v1469_v32 = vpop.f32.mrb[11].mxu1 }
 0x4b6   :  { %v1020_v33 = vpack.c.bf16 %v1019_v31, %v1019_v31 }
 0x4b8   :  { %1487 = vmatmul.mubr.bf16.vlgmr.msra.gmra.mrb[12].mxu0 %v1020_v33 }
 0x58b   :  { %v1124_v37 = vpop.f32.mrb[12].mxu0 }
 0x58c   :  { %v1125_v38 = vadd.f32 %v1308_v36, %v1124_v37  ;;  %v1488_v40 = vpop.f32.mrb[13].mxu0 }
 0x58d   :  { %v1127_v41 = vpop.f32.mrb[14].mxu0 }
 0x58e   :  { %v1130_v42 = vadd.f32 %v1125_v38, %v908_v15  ;;  %v1489_v43 = vpop.f32.mrb[15].mxu0 }
 0x590   :  { %v1131_v44 = vmax.f32 %v1130_v42, 0.0 }
 0x592   :  { %v1132_v45 = vpack.c.bf16 %v1131_v44, %v1131_v44 }
 0x594   :  { %1507 = vmatmul.mubr.bf16.vlgmr.msra.gmra.mrb[12].mxu1 %v1132_v45 }
 0x667   :  { %v1231_v22 = vpop.f32.mrb[12].mxu1 }
 0x668   :  { %1237 = vst [vmem:[#allocation2] sm:$0x3] %v1231_v22  ;;  %v1508_v46 = vpop.f32.mrb[13].mxu1 }
 0x669   :  { %v1234_v47 = vpop.f32.mrb[14].mxu1 }
 0x66a   :  { %1593 = shalt.err (!%p1590_p4)
}
 0x66b   :  { %s1594_s5 = scalar_lea.hbm %s1976_s4, 32 }
 0x66c   :  { %p1595_p5 = scmp.ne.s32.totalorder %s1976_s4, %s1594_s5  ;;  %p1598_p6 = scmp.lt.u32.totalorder %s1594_s5, %s1976_s4 }
 0x66e   :  { %p1600_p7 = pnand %p1598_p6, %p1595_p5 }
 0x670   :  { %1603 = shalt.err (!%p1600_p7)
}
 0x671   :  { %1247 = dma.vmem_to_hbm [thread:$0]  %s1245_s29, 32, %s1976_s4, [#allocation3]   ;;  %v1509_v48 = vpop.f32.mrb[15].mxu1 }
 0x672   :  { %1604 = dma.done.wait [#allocation3], 32  }
 0x673   :  { %1605 = vsyncadd [#allocation3], 4294967264 }
 0x674   :  { %1251 = vsyncpa [#allocation3], 1 }

</bundles_post_ra>
